<compile_context>
chip_gen: v6e
topology: v6e:2x2x1
jax: 0.10.0
libtpu: 0.0.40
codegen_flags: <defaults>
</compile_context>

<pallas_src>
import functools

import jax
import jax.numpy as jnp
from jax import lax
from jax.experimental import pallas as pl
from jax.experimental.pallas import tpu as pltpu


def _round_up(x, m):
    return (x + m - 1) // m * m


def _vmem_capacity_bytes():
    try:
        return int(pltpu.get_tpu_info().vmem_capacity_bytes)
    except Exception:
        return 64 << 20   # v7x per-TC VMEM: safe lower bound across generations


def _resblock_kernel(x_ref, w_ref, b_ref, o_ref, *, mxu_dtype):
    """One (tm, tn) output tile of  out = x + SiLU(x @ W^T + b).

    Grid is (column-tile j [outer], row-tile i [inner]); the weight tile is
    resident across the inner row axis, so W is streamed from HBM exactly once.

    x_ref : (tm, Hp) f32   full-K row tile of the input
    w_ref : (tn, Hp)       PyTorch-layout (out, in) weight rows for column tile j
    b_ref : (1,  tn) f32   bias slice
    o_ref : (tm, tn)
    """
    x = x_ref[...]                                        # f32 row tile
    xm = x if mxu_dtype is None else x.astype(mxu_dtype)

    # y = x @ W^T : contract x dim 1 with W dim 1 (PyTorch (out, in) consumed
    # natively — no wrapper-side H^2 transpose pass).
    # TODO(synk): confirm via pl.lower_as_mlir that Mosaic lowers this as a
    # native transposed matmul (no in-kernel XLU transpose contending with MXU
    # pushes); if not, pre-transpose W once in the wrapper instead.
    z = lax.dot_general(xm, w_ref[...], (((1,), (1,)), ((), ())),
                        preferred_element_type=jnp.float32)
    z = z + b_ref[...]                                    # f32
    silu = z * jax.nn.sigmoid(z)                          # f32 on VPU + EUP

    tn = o_ref.shape[-1]
    if x_ref.shape[-1] == tn:
        x_res = x                                         # no column tiling
    else:
        col = pl.multiple_of(pl.program_id(0) * tn, 128)  # lane-aligned slice
        x_res = x_ref[:, pl.ds(col, tn)]
    o_ref[...] = (x_res + silu).astype(o_ref.dtype)


def _choose_tiles(m_rows, hp, w_bytes, tm_req, vmem_budget):
    """Largest (tm, tn) whose pipelined tiles fit the VMEM budget.

    Weight is counted once when fully resident (tn == hp, single-buffered),
    twice (double-buffered) otherwise.  Prefers tn that is a multiple of 256
    (v6e/v7x MXU column fill); 128 only when forced."""
    tm = min(_round_up(tm_req, 8), _round_up(max(m_rows, 1), 8))

    k = hp // 128
    cands = sorted({128 * d for d in range(1, k + 1) if k % d == 0},
                   key=lambda c: (c % 256 == 0, c), reverse=True)

    def need(tm_, tn_):
        w_bufs = 1 if tn_ == hp else 2
        return (w_bufs * tn_ * hp * w_bytes      # weight tile(s)
                + 2 * tm_ * hp * 4               # double-buffered f32 x tile
                + 2 * tm_ * tn_ * 4              # double-buffered out tile
                + 2 * tn_ * 4)                   # bias

    tn = cands[-1]
    for cand in cands:
        if need(tm, cand) <= vmem_budget:
            tn = cand
            break
    while need(tm, tn) > vmem_budget and tm > 8:
        tm = _round_up(tm // 2, 8)
    return tm, tn, need(tm, tn)


def resblock_forward(x, weight, bias, *, tm=512, mxu_dtype=jnp.bfloat16,
                     vmem_budget=None):
    """out = x + SiLU(x @ W^T + b).

    x: (..., H) f32; weight: (H, H) PyTorch (out, in) layout; bias: (H,).
    mxu_dtype: dtype for the matmul operands (default bf16 — MXU-native on
    v5e/v6e/v7x); accumulation, SiLU and the residual stay f32.  Pass
    mxu_dtype=None for a strict-f32 matmul (exact parity with the module).
    """
    orig_shape = x.shape
    H = orig_shape[-1]
    x2 = x.reshape(-1, H)
    M = x2.shape[0]

    # Lane-dense feature axis: pad H up to a multiple of 128 (no-op for the
    # usual power-of-two hidden sizes).
    Hp = _round_up(H, 128)
    if Hp != H:
        x2 = jnp.pad(x2, ((0, 0), (0, Hp - H)))
        weight = jnp.pad(weight, ((0, Hp - H), (0, Hp - H)))
        bias = jnp.pad(bias, (0, Hp - H))

    w_in = weight if mxu_dtype is None else weight.astype(mxu_dtype)
    b2 = bias.astype(jnp.float32).reshape(1, Hp)
    w_bytes = jnp.dtype(w_in.dtype).itemsize

    capacity = _vmem_capacity_bytes()
    if vmem_budget is None:
        vmem_budget = int(0.7 * capacity)        # generation-aware default
    vmem_budget = min(int(vmem_budget), int(0.9 * capacity))

    tm_eff, tn, vmem_need = _choose_tiles(M, Hp, w_bytes, tm, vmem_budget)

    n_row = pl.cdiv(M, tm_eff)    # no row padding: Pallas masks the last block
    n_col = Hp // tn
    grid = (n_col, n_row)         # column-outer / row-inner: W streamed once

    kernel = functools.partial(_resblock_kernel, mxu_dtype=mxu_dtype)

    cost = pl.CostEstimate(
        flops=2 * M * Hp * Hp,
        transcendentals=M * Hp,                            # sigmoid
        bytes_accessed=(n_col * M * Hp * 4                 # x read per col tile
                        + Hp * Hp * w_bytes                # W read exactly once
                        + Hp * 4                           # bias
                        + M * Hp * x.dtype.itemsize),      # output write
    )

    # Limit includes headroom for the non-single-buffered fallback below.
    vmem_limit = int(min(max(vmem_need + tn * Hp * w_bytes + (4 << 20), 32 << 20),
                         int(0.95 * capacity)))

    def build(weight_spec):
        return pl.pallas_call(
            kernel,
            out_shape=jax.ShapeDtypeStruct((M, Hp), x.dtype),
            grid_spec=pltpu.PrefetchScalarGridSpec(
                num_scalar_prefetch=0,
                grid=grid,
                in_specs=[
                    pl.BlockSpec((tm_eff, Hp), lambda j, i: (i, 0)),  # x rows
                    weight_spec,                                      # W col tile
                    pl.BlockSpec((1, tn), lambda j, i: (0, j)),       # bias slice
                ],
                out_specs=pl.BlockSpec((tm_eff, tn), lambda j, i: (i, j)),
            ),
            compiler_params=pltpu.CompilerParams(
                dimension_semantics=("parallel", "parallel"),
                vmem_limit_bytes=vmem_limit,
            ),
            cost_estimate=cost,
        )

    w_map = lambda j, i: (j, 0)
    if n_col == 1:
        # W fully resident: single-buffer it (its block index never changes).
        try:
            out = jax.block_until_ready(
                build(pl.BlockSpec((tn, Hp), w_map,
                                   pipeline_mode=pl.Buffered(1)))(x2, w_in, b2))
        except Exception:
            out = build(pl.BlockSpec((tn, Hp), w_map))(x2, w_in, b2)
    else:
        out = build(pl.BlockSpec((tn, Hp), w_map))(x2, w_in, b2)

    return out[:, :H].reshape(orig_shape)


def resblock_reference(x, weight, bias):
    z = jnp.einsum("...i,oi->...o", x, weight) + bias
    return x + z * jax.nn.sigmoid(z)


if __name__ == "__main__":
    key = jax.random.PRNGKey(0)
    batch, seq, hidden = 4, 8, 32
    k_x, k_b, k_w = jax.random.split(key, 3)

    x = jax.random.normal(k_x, (batch, seq, hidden), dtype=jnp.float32)

    # Module-faithful params: zero-initialized weight, default nn.Linear bias init.
    weight0 = jnp.zeros((hidden, hidden), dtype=jnp.float32)
    bound = 1.0 / float(hidden ** 0.5)
    bias = jax.random.uniform(k_b, (hidden,), minval=-bound, maxval=bound,
                              dtype=jnp.float32)

    out = jax.block_until_ready(resblock_forward(x, weight0, bias))
    ref = resblock_reference(x, weight0, bias)
    assert out.shape == x.shape
    assert jnp.allclose(out, ref, atol=1e-5, rtol=1e-5), "mismatch (module init)"

    # Non-trivial weights through the default bf16-operand MXU path.
    weight1 = 0.1 * jax.random.normal(k_w, (hidden, hidden), dtype=jnp.float32)
    out1 = jax.block_until_ready(resblock_forward(x, weight1, bias))
    ref1 = resblock_reference(x, weight1, bias)
    assert jnp.allclose(out1, ref1, atol=5e-2, rtol=5e-2), "mismatch (bf16 matmul)"

    # Strict f32 matmul path for exact parity with the PyTorch module.
    out2 = jax.block_until_ready(
        resblock_forward(x, weight1, bias, mxu_dtype=None))
    assert jnp.allclose(out2, ref1, atol=2e-3, rtol=2e-3), "mismatch (f32 matmul)"

    print("KERNEL_OK")
</pallas_src>

<mosaic_0001>
module attributes {stable_mosaic.version = 11 : i64} {
  func.func @_resblock_kernel(%arg0: i32, %arg1: i32, %arg2: memref<32x128xf32, #tpu.memory_space<vmem>>, %arg3: memref<128x128xbf16, #tpu.memory_space<vmem>>, %arg4: memref<1x128xf32, #tpu.memory_space<vmem>>, %arg5: memref<32x128xf32, #tpu.memory_space<vmem>>) attributes {dimension_semantics = [#tpu.dimension_semantics<parallel>, #tpu.dimension_semantics<parallel>], iteration_bounds = array<i64: 1, 1>, scalar_prefetch = 0 : i64, scratch_operands = 0 : i64, tpu.core_type = #tpu.core_type<tc>, window_params = [{transform_indices = @transform_0, window_bounds = array<i64: 32, 128>}, {pipeline_mode = #tpu.pipeline_mode<synchronous>, transform_indices = @transform_1, window_bounds = array<i64: 128, 128>}, {transform_indices = @transform_2, window_bounds = array<i64: 1, 128>}, {transform_indices = @transform_3, window_bounds = array<i64: 32, 128>}]} {
    %c0 = arith.constant 0 : index
    %c0_0 = arith.constant 0 : index
    %0 = vector.load %arg2[%c0, %c0_0] : memref<32x128xf32, #tpu.memory_space<vmem>>, vector<32x128xf32>
    %1 = arith.truncf %0 : vector<32x128xf32> to vector<32x128xbf16>
    %c0_1 = arith.constant 0 : index
    %c0_2 = arith.constant 0 : index
    %2 = vector.load %arg3[%c0_1, %c0_2] : memref<128x128xbf16, #tpu.memory_space<vmem>>, vector<128x128xbf16>
    %cst = arith.constant dense<0.000000e+00> : vector<32x128xf32>
    %3 = tpu.matmul %1, %2, %cst {dimension_numbers = #tpu.dot_dimension_numbers<[1], [1], [0], [0], [0, 0, 1, 0], [], []>} : vector<32x128xbf16>, vector<128x128xbf16>, vector<32x128xf32> -> vector<32x128xf32>
    %c0_3 = arith.constant 0 : index
    %c0_4 = arith.constant 0 : index
    %4 = vector.load %arg4[%c0_3, %c0_4] : memref<1x128xf32, #tpu.memory_space<vmem>>, vector<1x128xf32>
    %5 = vector.broadcast %4 : vector<1x128xf32> to vector<32x128xf32>
    %6 = arith.addf %3, %5 : vector<32x128xf32>
    %7 = arith.negf %6 : vector<32x128xf32>
    %8 = math.exp %7 : vector<32x128xf32>
    %cst_5 = arith.constant 1.000000e+00 : f32
    %9 = vector.broadcast %cst_5 : f32 to vector<32x128xf32>
    %10 = arith.addf %9, %8 : vector<32x128xf32>
    %11 = arith.divf %9, %10 : vector<32x128xf32>
    %12 = arith.mulf %6, %11 : vector<32x128xf32>
    %13 = arith.addf %0, %12 : vector<32x128xf32>
    %c0_6 = arith.constant 0 : index
    %c0_7 = arith.constant 0 : index
    %14 = vector.load %arg5[%c0_6, %c0_7] : memref<32x128xf32, #tpu.memory_space<vmem>>, vector<32x128xf32>
    tpu.vector_store %arg5[%c0_6, %c0_7], %13 {strides = array<i32>} : memref<32x128xf32, #tpu.memory_space<vmem>>, vector<32x128xf32>,
    return
  }
  func.func @transform_0(%arg0: i32, %arg1: i32) -> (i32, i32) {
    %c0_i32 = arith.constant 0 : i32
    %c0_i32_0 = arith.constant 0 : i32
    return %arg1, %c0_i32 : i32, i32
  }
  func.func @transform_1(%arg0: i32, %arg1: i32) -> (i32, i32) {
    %c0_i32 = arith.constant 0 : i32
    %c0_i32_0 = arith.constant 0 : i32
    return %arg0, %c0_i32 : i32, i32
  }
  func.func @transform_2(%arg0: i32, %arg1: i32) -> (i32, i32) {
    %c0_i32 = arith.constant 0 : i32
    %c0_i32_0 = arith.constant 0 : i32
    return %c0_i32, %arg0 : i32, i32
  }
  func.func @transform_3(%arg0: i32, %arg1: i32) -> (i32, i32) {
    %c0_i32 = arith.constant 0 : i32
    return %arg1, %arg0 : i32, i32
  }
}

module attributes {stable_mosaic.version = 11 : i64} {
  func.func @_resblock_kernel(%arg0: i32, %arg1: i32, %arg2: memref<32x128xf32, #tpu.memory_space<vmem>>, %arg3: memref<128x128xbf16, #tpu.memory_space<vmem>>, %arg4: memref<1x128xf32, #tpu.memory_space<vmem>>, %arg5: memref<32x128xf32, #tpu.memory_space<vmem>>) attributes {dimension_semantics = [#tpu.dimension_semantics<parallel>, #tpu.dimension_semantics<parallel>], iteration_bounds = array<i64: 1, 1>, scalar_prefetch = 0 : i64, scratch_operands = 0 : i64, tpu.core_type = #tpu.core_type<tc>, window_params = [{transform_indices = @transform_0, window_bounds = array<i64: 32, 128>}, {transform_indices = @transform_1, window_bounds = array<i64: 128, 128>}, {transform_indices = @transform_2, window_bounds = array<i64: 1, 128>}, {transform_indices = @transform_3, window_bounds = array<i64: 32, 128>}]} {
    %c0 = arith.constant 0 : index
    %c0_0 = arith.constant 0 : index
    %0 = vector.load %arg2[%c0, %c0_0] : memref<32x128xf32, #tpu.memory_space<vmem>>, vector<32x128xf32>
    %1 = arith.truncf %0 : vector<32x128xf32> to vector<32x128xbf16>
    %c0_1 = arith.constant 0 : index
    %c0_2 = arith.constant 0 : index
    %2 = vector.load %arg3[%c0_1, %c0_2] : memref<128x128xbf16, #tpu.memory_space<vmem>>, vector<128x128xbf16>
    %cst = arith.constant dense<0.000000e+00> : vector<32x128xf32>
    %3 = tpu.matmul %1, %2, %cst {dimension_numbers = #tpu.dot_dimension_numbers<[1], [1], [0], [0], [0, 0, 1, 0], [], []>} : vector<32x128xbf16>, vector<128x128xbf16>, vector<32x128xf32> -> vector<32x128xf32>
    %c0_3 = arith.constant 0 : index
    %c0_4 = arith.constant 0 : index
    %4 = vector.load %arg4[%c0_3, %c0_4] : memref<1x128xf32, #tpu.memory_space<vmem>>, vector<1x128xf32>
    %5 = vector.broadcast %4 : vector<1x128xf32> to vector<32x128xf32>
    %6 = arith.addf %3, %5 : vector<32x128xf32>
    %7 = arith.negf %6 : vector<32x128xf32>
    %8 = math.exp %7 : vector<32x128xf32>
    %cst_5 = arith.constant 1.000000e+00 : f32
    %9 = vector.broadcast %cst_5 : f32 to vector<32x128xf32>
    %10 = arith.addf %9, %8 : vector<32x128xf32>
    %11 = arith.divf %9, %10 : vector<32x128xf32>
    %12 = arith.mulf %6, %11 : vector<32x128xf32>
    %13 = arith.addf %0, %12 : vector<32x128xf32>
    %c0_6 = arith.constant 0 : index
    %c0_7 = arith.constant 0 : index
    %14 = vector.load %arg5[%c0_6, %c0_7] : memref<32x128xf32, #tpu.memory_space<vmem>>, vector<32x128xf32>
    tpu.vector_store %arg5[%c0_6, %c0_7], %13 {strides = array<i32>} : memref<32x128xf32, #tpu.memory_space<vmem>>, vector<32x128xf32>,
    return
  }
  func.func @transform_0(%arg0: i32, %arg1: i32) -> (i32, i32) {
    %c0_i32 = arith.constant 0 : i32
    %c0_i32_0 = arith.constant 0 : i32
    return %arg1, %c0_i32 : i32, i32
  }
  func.func @transform_1(%arg0: i32, %arg1: i32) -> (i32, i32) {
    %c0_i32 = arith.constant 0 : i32
    %c0_i32_0 = arith.constant 0 : i32
    return %arg0, %c0_i32 : i32, i32
  }
  func.func @transform_2(%arg0: i32, %arg1: i32) -> (i32, i32) {
    %c0_i32 = arith.constant 0 : i32
    %c0_i32_0 = arith.constant 0 : i32
    return %c0_i32, %arg0 : i32, i32
  }
  func.func @transform_3(%arg0: i32, %arg1: i32) -> (i32, i32) {
    %c0_i32 = arith.constant 0 : i32
    return %arg1, %arg0 : i32, i32
  }
}

</mosaic_0001>

<bundles_post_ra>
// kernel: tpu_custom_call.1
= control target key start
LH: loop header
LB: loop body
LE: loop exit
PB: predicated region body
PF: predicated region fallthrough
CT: control target
= control target key end

     0   :  { %8 = vsyncpa [#allocation3], 0  ;;  %s413_s0 = inlined_call_operand.hbm [shape: f32[32,128], index: 0, kind: input, shape index: {}]   ;;  %s414_s1 = inlined_call_operand.hbm [shape: bf16[128,128], index: 1, kind: input, shape index: {}]   ;;  %s415_s2 = inlined_call_operand.vmem [shape: f32[1,128], index: 2, kind: input, shape index: {}]   ;;  %s416_s3 = inlined_call_operand.hbm [shape: f32[32,128], index: 3, kind: output, shape index: {}]  }
   0x1   :  { %9 = vsyncpa [#allocation6], 0 }
   0x2   :  { %10 = vsyncpa [#allocation4], 0  ;;  %s364_s12 = smov [#allocation2]  }
   0x3   :  { %s16_s13 = sshll.u32 %s364_s12, 4  ;;  %s17_s13 = int_to_ptr.vmem [resolvable:$true] %s16_s13 }
   0x4   :  { %s306_s14 = scalar_lea.vmem %s17_s13, 512  ;;  %p311_p1 = scmp.lt.s32.totalorder %s17_s13, %s17_s13 }
   0x5   :  { %p307_p0 = scmp.ne.s32.totalorder %s17_s13, %s306_s14  ;;  %p312_p2 = scmp.lt.s32.totalorder %s306_s14, %s306_s14 }
   0x7   :  { %p313_p3 = por %p312_p2, %p311_p1 }
   0x9   :  { %p314_p4 = pnand %p313_p3, %p307_p0 }
   0xb   :  { %317 = shalt.err (!%p314_p4)
}
   0xc   :  { %s365_s15 = smov 128   ;;  %s366_s16 = smov 8  }
   0xd   :  { %22 = dma.hbm_to_vmem [thread:$0]  %s413_s0, 512, %s17_s13, [#allocation3], %s365_s15, %s365_s15, %s366_s16  }
   0xe   :  { %s367_s19 = smov [#allocation5]  }
   0xf   :  { %s28_s20 = sshll.u32 %s367_s19, 4  ;;  %s29_s20 = int_to_ptr.vmem [resolvable:$true] %s28_s20 }
  0x10   :  { %s326_s21 = scalar_lea.vmem %s29_s20, 1024  ;;  %p331_p6 = scmp.lt.s32.totalorder %s29_s20, %s29_s20 }
  0x11   :  { %p327_p5 = scmp.ne.s32.totalorder %s29_s20, %s326_s21  ;;  %p332_p7 = scmp.lt.s32.totalorder %s326_s21, %s326_s21 }
  0x13   :  { %p333_p8 = por %p332_p7, %p331_p6 }
  0x15   :  { %p334_p9 = pnand %p333_p8, %p327_p5 }
  0x17   :  { %337 = shalt.err (!%p334_p9)
}
  0x18   :  { %s368_s22 = smov 64   ;;  %s369_s23 = smov 4  }
  0x19   :  { %34 = dma.hbm_to_vmem [thread:$0]  %s414_s1, 1024, %s29_s20, [#allocation6], %s368_s22, %s368_s22, %s369_s23  }
  0x1a   :  { %358 = dma.done.wait [#allocation3], 512  }
  0x1b   :  { %359 = vsyncadd [#allocation3], 4294966784 }
  0x1c   :  { %360 = dma.done.wait [#allocation6], 1024  }
  0x1d   :  { %361 = vsyncadd [#allocation6], 4294966272  ;;  %v274_v0 = vld [vmem:[#allocation5 + $0x38] sm:$0xff]   ;;  %v275_v1 = vld [vmem:[#allocation5 + $0x30] sm:$0xff]  }
  0x1e   :  { %247 = vmatprep.subr.bf16.mxu0 %v274_v0  ;;  %v276_v2 = vld [vmem:[#allocation5 + $0x28] sm:$0xff]   ;;  %v44_v3 = vld [vmem:[#allocation2] sm:$0xff]  ;;  %v278_v7 = vld [vmem:[#allocation5 + $0x18] sm:$0xff]  }
  0x1f   :  { %248 = vmatpush3.bf16.xpose.msra.mxu0 %v274_v0  ;;  %v400_v4 = vld [vmem:[#allocation2 + $0x8] sm:$0xff]  ;;  %v277_v6 = vld [vmem:[#allocation5 + $0x20] sm:$0xff]   ;;  %v279_v8 = vld [vmem:[#allocation5 + $0x10] sm:$0xff]  }
  0x20   :  { %249 = vmatprep.subr.bf16.mxu0 %v275_v1  ;;  %v48_v5 = vpack.c.bf16 %v400_v4, %v44_v3  ;;  %v280_v9 = vld [vmem:[#allocation5 + $0x8] sm:$0xff]   ;;  %v281_v10 = vld [vmem:[#allocation5] sm:$0xff]   ;;  %v46_v11 = vld [vmem:[#allocation2 + $0x10] sm:$0xff] }
  0x21   :  { %v47_v12 = vld [vmem:[#allocation2 + $0x18] sm:$0xff]  ;;  %v224_v14 = vld [vmem:[%s415_s2] ss:$0 sm:$0xff]  ;;  %s370_s2 = smov [#allocation7]  }
  0x22   :  { %263 = vmatprep.mubr.bf16.mxu0 %v48_v5  ;;  %v49_v13 = vpack.c.bf16 %v47_v12, %v46_v11  ;;  %s211_s26 = sshll.u32 %s370_s2, 4  ;;  %s212_s26 = int_to_ptr.vmem [resolvable:$true] %s211_s26 }
  0x23   :  { %s338_s27 = scalar_lea.vmem %s212_s26, 512  ;;  %p343_p11 = scmp.lt.s32.totalorder %s212_s26, %s212_s26 }
  0x24   :  { %p339_p10 = scmp.ne.s32.totalorder %s212_s26, %s338_s27  ;;  %p344_p12 = scmp.lt.s32.totalorder %s338_s27, %s338_s27 }
  0x26   :  { %p345_p13 = por %p344_p12, %p343_p11 }
  0x27   :  { %250 = vmatpush3.bf16.xpose.msra.mxu0 %v275_v1 }
  0x28   :  { %251 = vmatprep.subr.bf16.mxu0 %v276_v2  ;;  %p346_p0 = pnand %p345_p13, %p339_p10 }
  0x2f   :  { %252 = vmatpush3.bf16.xpose.msra.mxu0 %v276_v2 }
  0x30   :  { %253 = vmatprep.subr.bf16.mxu0 %v277_v6 }
  0x37   :  { %254 = vmatpush3.bf16.xpose.msra.mxu0 %v277_v6 }
  0x38   :  { %255 = vmatprep.subr.bf16.mxu0 %v278_v7 }
  0x3f   :  { %256 = vmatpush3.bf16.xpose.msra.mxu0 %v278_v7 }
  0x40   :  { %257 = vmatprep.subr.bf16.mxu0 %v279_v8 }
  0x47   :  { %258 = vmatpush3.bf16.xpose.msra.mxu0 %v279_v8 }
  0x48   :  { %259 = vmatprep.subr.bf16.mxu0 %v280_v9 }
  0x4f   :  { %260 = vmatpush3.bf16.xpose.msra.mxu0 %v280_v9 }
  0x50   :  { %261 = vmatprep.subr.bf16.mxu0 %v281_v10 }
  0x57   :  { %262 = vmatpush3.bf16.xpose.msra.mxu0 %v281_v10 }
  0x5e   :  { %264 = vmatmul.mubr.bf16.vlgmr.msra.gmra.mxu0 %v49_v13 }
 0x11e   :  { %v265_v15 = vpop.f32.mrf.mxu0 }
 0x11f   :  { %v164_v16 = vadd.f32 %v265_v15, %v224_v14 }
 0x120   :  { %v155_v17 = vpop.f32.mrf.mxu0 }
 0x121   :  { %v235_v18 = vmul.f32 -1.442695, %v164_v16  ;;  %v156_v19 = vadd.f32 %v224_v14, %v155_v17 }
 0x122   :  { %v266_v20 = vpop.f32.mrf.mxu0 }
 0x123   :  { %282 = vpow2.f32 %v235_v18  ;;  %v233_v21 = vmul.f32 -1.442695, %v156_v19  ;;  %v167_v22 = vadd.f32 %v266_v20, %v224_v14 }
 0x124   :  { %v158_v23 = vpop.f32.mrf.mxu0 }
 0x125   :  { %284 = vpow2.f32 %v233_v21  ;;  %v236_v24 = vmul.f32 -1.442695, %v167_v22  ;;  %v159_v25 = vadd.f32 %v224_v14, %v158_v23 }
 0x127   :  { %286 = vpow2.f32 %v236_v24  ;;  %v234_v26 = vmul.f32 -1.442695, %v159_v25 }
 0x129   :  { %288 = vpow2.f32 %v234_v26 }
 0x130   :  { %v283_v27 = vpop.eup %282 }
 0x131   :  { %v184_v28 = vadd.f32 1.0, %v283_v27 }
 0x132   :  { %v285_v29 = vpop.eup %284 }
 0x133   :  { %290 = vrcp.f32 %v184_v28  ;;  %v182_v30 = vadd.f32 1.0, %v285_v29 }
 0x134   :  { %v287_v31 = vpop.eup %286 }
 0x135   :  { %292 = vrcp.f32 %v182_v30  ;;  %v185_v32 = vadd.f32 1.0, %v287_v31 }
 0x136   :  { %v289_v33 = vpop.eup %288 }
 0x137   :  { %294 = vrcp.f32 %v185_v32  ;;  %v183_v34 = vadd.f32 1.0, %v289_v33 }
 0x139   :  { %296 = vrcp.f32 %v183_v34 }
 0x140   :  { %v291_v35 = vpop.eup %290 }
 0x141   :  { %v196_v36 = vmul.f32 %v291_v35, %v164_v16 }
 0x142   :  { %v293_v37 = vpop.eup %292 }
 0x143   :  { %v200_v38 = vadd.f32 %v196_v36, %v46_v11  ;;  %v194_v39 = vmul.f32 %v293_v37, %v156_v19 }
 0x144   :  { %v295_v40 = vpop.eup %294 }
 0x145   :  { %204 = vst [vmem:[#allocation7 + $0x10] sm:$0xff] %v200_v38  ;;  %v198_v41 = vadd.f32 %v194_v39, %v44_v3  ;;  %v197_v42 = vmul.f32 %v295_v40, %v167_v22 }
 0x146   :  { %v297_v43 = vpop.eup %296 }
 0x147   :  { %202 = vst [vmem:[#allocation7] sm:$0xff] %v198_v41  ;;  %v201_v44 = vadd.f32 %v197_v42, %v47_v12  ;;  %v195_v45 = vmul.f32 %v297_v43, %v159_v25 }
 0x149   :  { %205 = vst [vmem:[#allocation7 + $0x18] sm:$0xff] %v201_v44  ;;  %v199_v46 = vadd.f32 %v195_v45, %v400_v4 }
 0x14b   :  { %203 = vst [vmem:[#allocation7 + $0x8] sm:$0xff] %v199_v46 }
 0x14c   :  { %349 = shalt.err (!%p346_p0)
}
 0x14d   :  { %217 = dma.vmem_to_hbm [thread:$0]  %s212_s26, 512, %s416_s3, [#allocation4], %s365_s15, %s365_s15, %s366_s16  }
 0x14e   :  { %362 = dma.done.wait [#allocation4], 512  }
 0x14f   :  { %363 = vsyncadd [#allocation4], 4294966784 }
 0x150   :  { %221 = vsyncpa [#allocation3], 1 }
 0x151   :  { %222 = vsyncpa [#allocation6], 1 }
 0x152   :  { %223 = vsyncpa [#allocation4], 1 }

// kernel: tpu_custom_call.1
= control target key start
LH: loop header
LB: loop body
LE: loop exit
PB: predicated region body
PF: predicated region fallthrough
CT: control target
= control target key end

     0   :  { %8 = vsyncpa [#allocation3], 0  ;;  %s413_s0 = inlined_call_operand.hbm [shape: f32[32,128], index: 0, kind: input, shape index: {}]   ;;  %s414_s1 = inlined_call_operand.hbm [shape: bf16[128,128], index: 1, kind: input, shape index: {}]   ;;  %s415_s2 = inlined_call_operand.vmem [shape: f32[1,128], index: 2, kind: input, shape index: {}]   ;;  %s416_s3 = inlined_call_operand.hbm [shape: f32[32,128], index: 3, kind: output, shape index: {}]  }
   0x1   :  { %9 = vsyncpa [#allocation6], 0 }
   0x2   :  { %10 = vsyncpa [#allocation4], 0  ;;  %s364_s12 = smov [#allocation2]  }
   0x3   :  { %s16_s13 = sshll.u32 %s364_s12, 4  ;;  %s17_s13 = int_to_ptr.vmem [resolvable:$true] %s16_s13 }
   0x4   :  { %s306_s14 = scalar_lea.vmem %s17_s13, 512  ;;  %p311_p1 = scmp.lt.s32.totalorder %s17_s13, %s17_s13 }
   0x5   :  { %p307_p0 = scmp.ne.s32.totalorder %s17_s13, %s306_s14  ;;  %p312_p2 = scmp.lt.s32.totalorder %s306_s14, %s306_s14 }
   0x7   :  { %p313_p3 = por %p312_p2, %p311_p1 }
   0x9   :  { %p314_p4 = pnand %p313_p3, %p307_p0 }
   0xb   :  { %317 = shalt.err (!%p314_p4)
}
   0xc   :  { %s365_s15 = smov 128   ;;  %s366_s16 = smov 8  }
   0xd   :  { %22 = dma.hbm_to_vmem [thread:$0]  %s413_s0, 512, %s17_s13, [#allocation3], %s365_s15, %s365_s15, %s366_s16  }
   0xe   :  { %s367_s19 = smov [#allocation5]  }
   0xf   :  { %s28_s20 = sshll.u32 %s367_s19, 4  ;;  %s29_s20 = int_to_ptr.vmem [resolvable:$true] %s28_s20 }
  0x10   :  { %s326_s21 = scalar_lea.vmem %s29_s20, 1024  ;;  %p331_p6 = scmp.lt.s32.totalorder %s29_s20, %s29_s20 }
  0x11   :  { %p327_p5 = scmp.ne.s32.totalorder %s29_s20, %s326_s21  ;;  %p332_p7 = scmp.lt.s32.totalorder %s326_s21, %s326_s21 }
  0x13   :  { %p333_p8 = por %p332_p7, %p331_p6 }
  0x15   :  { %p334_p9 = pnand %p333_p8, %p327_p5 }
  0x17   :  { %337 = shalt.err (!%p334_p9)
}
  0x18   :  { %s368_s22 = smov 64   ;;  %s369_s23 = smov 4  }
  0x19   :  { %34 = dma.hbm_to_vmem [thread:$0]  %s414_s1, 1024, %s29_s20, [#allocation6], %s368_s22, %s368_s22, %s369_s23  }
  0x1a   :  { %358 = dma.done.wait [#allocation3], 512  }
  0x1b   :  { %359 = vsyncadd [#allocation3], 4294966784 }
  0x1c   :  { %360 = dma.done.wait [#allocation6], 1024  }
  0x1d   :  { %361 = vsyncadd [#allocation6], 4294966272  ;;  %v274_v0 = vld [vmem:[#allocation5 + $0x38] sm:$0xff]   ;;  %v275_v1 = vld [vmem:[#allocation5 + $0x30] sm:$0xff]  }
  0x1e   :  { %247 = vmatprep.subr.bf16.mxu0 %v274_v0  ;;  %v276_v2 = vld [vmem:[#allocation5 + $0x28] sm:$0xff]   ;;  %v44_v3 = vld [vmem:[#allocation2] sm:$0xff]  ;;  %v278_v7 = vld [vmem:[#allocation5 + $0x18] sm:$0xff]  }
  0x1f   :  { %248 = vmatpush3.bf16.xpose.msra.mxu0 %v274_v0  ;;  %v400_v4 = vld [vmem:[#allocation2 + $0x8] sm:$0xff]  ;;  %v277_v6 = vld [vmem:[#allocation5 + $0x20] sm:$0xff]   ;;  %v279_v8 = vld [vmem:[#allocation5 + $0x10] sm:$0xff]  }
  0x20   :  { %249 = vmatprep.subr.bf16.mxu0 %v275_v1  ;;  %v48_v5 = vpack.c.bf16 %v400_v4, %v44_v3  ;;  %v280_v9 = vld [vmem:[#allocation5 + $0x8] sm:$0xff]   ;;  %v281_v10 = vld [vmem:[#allocation5] sm:$0xff]   ;;  %v46_v11 = vld [vmem:[#allocation2 + $0x10] sm:$0xff] }
  0x21   :  { %v47_v12 = vld [vmem:[#allocation2 + $0x18] sm:$0xff]  ;;  %v224_v14 = vld [vmem:[%s415_s2] ss:$0 sm:$0xff]  ;;  %s370_s2 = smov [#allocation7]  }
  0x22   :  { %263 = vmatprep.mubr.bf16.mxu0 %v48_v5  ;;  %v49_v13 = vpack.c.bf16 %v47_v12, %v46_v11  ;;  %s211_s26 = sshll.u32 %s370_s2, 4  ;;  %s212_s26 = int_to_ptr.vmem [resolvable:$true] %s211_s26 }
  0x23   :  { %s338_s27 = scalar_lea.vmem %s212_s26, 512  ;;  %p343_p11 = scmp.lt.s32.totalorder %s212_s26, %s212_s26 }
  0x24   :  { %p339_p10 = scmp.ne.s32.totalorder %s212_s26, %s338_s27  ;;  %p344_p12 = scmp.lt.s32.totalorder %s338_s27, %s338_s27 }
  0x26   :  { %p345_p13 = por %p344_p12, %p343_p11 }
  0x27   :  { %250 = vmatpush3.bf16.xpose.msra.mxu0 %v275_v1 }
  0x28   :  { %251 = vmatprep.subr.bf16.mxu0 %v276_v2  ;;  %p346_p0 = pnand %p345_p13, %p339_p10 }
  0x2f   :  { %252 = vmatpush3.bf16.xpose.msra.mxu0 %v276_v2 }
  0x30   :  { %253 = vmatprep.subr.bf16.mxu0 %v277_v6 }
  0x37   :  { %254 = vmatpush3.bf16.xpose.msra.mxu0 %v277_v6 }
  0x38   :  { %255 = vmatprep.subr.bf16.mxu0 %v278_v7 }
  0x3f   :  { %256 = vmatpush3.bf16.xpose.msra.mxu0 %v278_v7 }
  0x40   :  { %257 = vmatprep.subr.bf16.mxu0 %v279_v8 }
  0x47   :  { %258 = vmatpush3.bf16.xpose.msra.mxu0 %v279_v8 }
  0x48   :  { %259 = vmatprep.subr.bf16.mxu0 %v280_v9 }
  0x4f   :  { %260 = vmatpush3.bf16.xpose.msra.mxu0 %v280_v9 }
  0x50   :  { %261 = vmatprep.subr.bf16.mxu0 %v281_v10 }
  0x57   :  { %262 = vmatpush3.bf16.xpose.msra.mxu0 %v281_v10 }
  0x5e   :  { %264 = vmatmul.mubr.bf16.vlgmr.msra.gmra.mxu0 %v49_v13 }
 0x11e   :  { %v265_v15 = vpop.f32.mrf.mxu0 }
 0x11f   :  { %v164_v16 = vadd.f32 %v265_v15, %v224_v14 }
 0x120   :  { %v155_v17 = vpop.f32.mrf.mxu0 }
 0x121   :  { %v235_v18 = vmul.f32 -1.442695, %v164_v16  ;;  %v156_v19 = vadd.f32 %v224_v14, %v155_v17 }
 0x122   :  { %v266_v20 = vpop.f32.mrf.mxu0 }
 0x123   :  { %282 = vpow2.f32 %v235_v18  ;;  %v233_v21 = vmul.f32 -1.442695, %v156_v19  ;;  %v167_v22 = vadd.f32 %v266_v20, %v224_v14 }
 0x124   :  { %v158_v23 = vpop.f32.mrf.mxu0 }
 0x125   :  { %284 = vpow2.f32 %v233_v21  ;;  %v236_v24 = vmul.f32 -1.442695, %v167_v22  ;;  %v159_v25 = vadd.f32 %v224_v14, %v158_v23 }
 0x127   :  { %286 = vpow2.f32 %v236_v24  ;;  %v234_v26 = vmul.f32 -1.442695, %v159_v25 }
 0x129   :  { %288 = vpow2.f32 %v234_v26 }
 0x130   :  { %v283_v27 = vpop.eup %282 }
 0x131   :  { %v184_v28 = vadd.f32 1.0, %v283_v27 }
 0x132   :  { %v285_v29 = vpop.eup %284 }
 0x133   :  { %290 = vrcp.f32 %v184_v28  ;;  %v182_v30 = vadd.f32 1.0, %v285_v29 }
 0x134   :  { %v287_v31 = vpop.eup %286 }
 0x135   :  { %292 = vrcp.f32 %v182_v30  ;;  %v185_v32 = vadd.f32 1.0, %v287_v31 }
 0x136   :  { %v289_v33 = vpop.eup %288 }
 0x137   :  { %294 = vrcp.f32 %v185_v32  ;;  %v183_v34 = vadd.f32 1.0, %v289_v33 }
 0x139   :  { %296 = vrcp.f32 %v183_v34 }
 0x140   :  { %v291_v35 = vpop.eup %290 }
 0x141   :  { %v196_v36 = vmul.f32 %v291_v35, %v164_v16 }
 0x142   :  { %v293_v37 = vpop.eup %292 }
 0x143   :  { %v200_v38 = vadd.f32 %v196_v36, %v46_v11  ;;  %v194_v39 = vmul.f32 %v293_v37, %v156_v19 }
 0x144   :  { %v295_v40 = vpop.eup %294 }
 0x145   :  { %204 = vst [vmem:[#allocation7 + $0x10] sm:$0xff] %v200_v38  ;;  %v198_v41 = vadd.f32 %v194_v39, %v44_v3  ;;  %v197_v42 = vmul.f32 %v295_v40, %v167_v22 }
 0x146   :  { %v297_v43 = vpop.eup %296 }
 0x147   :  { %202 = vst [vmem:[#allocation7] sm:$0xff] %v198_v41  ;;  %v201_v44 = vadd.f32 %v197_v42, %v47_v12  ;;  %v195_v45 = vmul.f32 %v297_v43, %v159_v25 }
 0x149   :  { %205 = vst [vmem:[#allocation7 + $0x18] sm:$0xff] %v201_v44  ;;  %v199_v46 = vadd.f32 %v195_v45, %v400_v4 }
 0x14b   :  { %203 = vst [vmem:[#allocation7 + $0x8] sm:$0xff] %v199_v46 }
 0x14c   :  { %349 = shalt.err (!%p346_p0)
}
 0x14d   :  { %217 = dma.vmem_to_hbm [thread:$0]  %s212_s26, 512, %s416_s3, [#allocation4], %s365_s15, %s365_s15, %s366_s16  }
 0x14e   :  { %362 = dma.done.wait [#allocation4], 512  }
 0x14f   :  { %363 = vsyncadd [#allocation4], 4294966784 }
 0x150   :  { %221 = vsyncpa [#allocation3], 1 }
 0x151   :  { %222 = vsyncpa [#allocation6], 1 }
 0x152   :  { %223 = vsyncpa [#allocation4], 1 }

</bundles_post_ra>
